<compile_context>
chip_gen: v7x
topology: tpu7x:2x2x1
jax: 0.10.0
libtpu: 0.0.40
codegen_flags: <defaults>
</compile_context>

<pallas_src>
import functools
import math

import jax
import jax.numpy as jnp
from jax import lax
from jax.experimental import pallas as pl
from jax.experimental.pallas import tpu as pltpu

_LANE = 128   # pad feature dims to multiples of this


def _round_up(v, m):
    return ((v + m - 1) // m) * m


def _pad2(a, rows, cols):
    return jnp.pad(a, ((0, rows - a.shape[0]), (0, cols - a.shape[1])))


def _vmem_limit_bytes():
    """Per-generation scoped-VMEM budget: ~75% of physical, capped at 100 MiB.

    v5e/v6e (128 MiB physical) -> ~96 MiB; v7x (64 MiB) -> 48 MiB;
    unknown / query failure -> 48 MiB (safe everywhere).
    """
    cap = 64 * 1024 * 1024
    try:
        info = pltpu.get_tpu_info()
        cap = int(getattr(info, "vmem_capacity_bytes", cap) or cap)
    except Exception:
        pass
    return min(cap * 3 // 4, 100 * 1024 * 1024)


def _cparams(sem, vmem_limit):
    return pltpu.CompilerParams(dimension_semantics=sem,
                                vmem_limit_bytes=int(vmem_limit))


# ---------------------------------------------------------------------------
# Tile geometry: divisor-based tiles (always divide n_pad), preference for an
# even number (>= 2) of row tiles on the leading parallel axis (v7x dual TC).
# ---------------------------------------------------------------------------
def _pick_npad(n):
    n128 = _round_up(n, _LANE)
    for mult in (1024, 512):      # friendlier multiples enable 512/1024 tiles
        np_ = _round_up(n, mult)
        if np_ * np_ <= 1.1 * n128 * n128:   # <10% extra adjacency traffic
            return np_
    return n128


def _best_div(blocks, want_blocks):
    best = 1
    for d in range(1, blocks + 1):
        if blocks % d == 0 and d <= want_blocks:
            best = d
    return best


def _choose_tiles(n, want_rows, want_k):
    n_pad = _pick_npad(n)
    blocks = n_pad // _LANE
    want_r = max(want_rows // _LANE, 1)
    want_c = max(want_k // _LANE, 1)
    tr_b = _best_div(blocks, want_r)
    num_i = blocks // tr_b
    if blocks > 1 and num_i % 2 == 1:
        even = [d for d in range(1, tr_b + 1)
                if blocks % d == 0 and (blocks // d) % 2 == 0]
        if even:
            tr_b = max(even)
        elif num_i == 1:
            tr_b = max(d for d in range(1, blocks) if blocks % d == 0)
    tk_b = _best_div(blocks, want_c)
    return tr_b * _LANE, tk_b * _LANE, n_pad


# ----------------------------------------------------------------------------
# Kernel 1: encoder pre-propagation  —  h0 = relu(x @ W + b), tiled over rows
# ----------------------------------------------------------------------------
def _encode_kernel(x_ref, w_ref, b_ref, o_ref):
    h = jnp.dot(x_ref[...], w_ref[...], preferred_element_type=jnp.float32)
    h = jnp.maximum(h + b_ref[...], 0.0)
    o_ref[...] = h.astype(o_ref.dtype)


def encode(x, w, b, *, tile_rows, vmem_limit):
    n, din = x.shape
    e = w.shape[1]
    return pl.pallas_call(
        _encode_kernel,
        out_shape=jax.ShapeDtypeStruct((n, e), x.dtype),
        grid=(n // tile_rows,),
        in_specs=[
            pl.BlockSpec((tile_rows, din), lambda i: (i, 0)),
            pl.BlockSpec((din, e), lambda i: (0, 0)),
            pl.BlockSpec((1, e), lambda i: (0, 0)),
        ],
        out_specs=pl.BlockSpec((tile_rows, e), lambda i: (i, 0)),
        compiler_params=_cparams(("parallel",), vmem_limit),
    )(x, w, b)


# ----------------------------------------------------------------------------
# Kernel 2: one propagation hop  —  h_out = g @ h_in.
#   * g is streamed in (tile_rows, tile_k) blocks (bf16 by default).
#   * h_in is passed chunked (num_k, tile_k, e); when it fits VMEM it is held
#     resident (constant index_map) and the k-th chunk is picked in-kernel.
#   * Accumulation goes straight into the resident f32 output block.
#   * Final-hop variant fuses the 2-layer projection head + L2 normalize.
# ----------------------------------------------------------------------------
def _propagate_kernel(g_ref, h_ref, o_ref, *, h_resident):
    k = pl.program_id(1)

    @pl.when(k == 0)
    def _init():
        o_ref[...] = jnp.zeros_like(o_ref)

    h_blk = h_ref[k] if h_resident else h_ref[0]
    o_ref[...] += jnp.dot(g_ref[...], h_blk, preferred_element_type=jnp.float32)


def propagate(g, h3, *, tile_rows, tile_k, h_resident, vmem_limit):
    n = g.shape[0]
    num_k, _, e = h3.shape
    if h_resident:
        h_spec = pl.BlockSpec((num_k, tile_k, e), lambda i, k: (0, 0, 0))
    else:
        h_spec = pl.BlockSpec((1, tile_k, e), lambda i, k: (k, 0, 0))
    return pl.pallas_call(
        functools.partial(_propagate_kernel, h_resident=h_resident),
        out_shape=jax.ShapeDtypeStruct((n, e), jnp.float32),
        grid=(n // tile_rows, num_k),
        in_specs=[pl.BlockSpec((tile_rows, tile_k), lambda i, k: (i, k)), h_spec],
        out_specs=pl.BlockSpec((tile_rows, e), lambda i, k: (i, 0)),
        compiler_params=_cparams(("parallel", "arbitrary"), vmem_limit),
    )(g, h3)


def _proj_norm(emb_f32, w1, b1, w2, b2, eps):
    mxu_dtype = w1.dtype
    t = jnp.dot(emb_f32.astype(mxu_dtype), w1, preferred_element_type=jnp.float32)
    t = jnp.maximum(t + b1, 0.0)
    p = jnp.dot(t.astype(mxu_dtype), w2, preferred_element_type=jnp.float32) + b2
    norm = jnp.sqrt(jnp.sum(p * p, axis=1, keepdims=True))
    return p / jnp.maximum(norm, eps)          # matches F.normalize(eps=1e-12)


def _propagate_proj_kernel(g_ref, h_ref, w1_ref, b1_ref, w2_ref, b2_ref,
                           o_ref, acc_ref, *, eps, h_resident):
    k = pl.program_id(1)

    @pl.when(k == 0)
    def _init():
        acc_ref[...] = jnp.zeros_like(acc_ref)

    h_blk = h_ref[k] if h_resident else h_ref[0]
    acc_ref[...] += jnp.dot(g_ref[...], h_blk, preferred_element_type=jnp.float32)

    @pl.when(k == pl.num_programs(1) - 1)
    def _fin():
        o_ref[...] = _proj_norm(acc_ref[...], w1_ref[...], b1_ref[...],
                                w2_ref[...], b2_ref[...], eps).astype(o_ref.dtype)


def propagate_project(g, h3, w1, b1, w2, b2, *, tile_rows, tile_k,
                      h_resident, vmem_limit, eps=1e-12):
    n = g.shape[0]
    num_k, _, e = h3.shape
    p_dim = w2.shape[1]
    if h_resident:
        h_spec = pl.BlockSpec((num_k, tile_k, e), lambda i, k: (0, 0, 0))
    else:
        h_spec = pl.BlockSpec((1, tile_k, e), lambda i, k: (k, 0, 0))
    return pl.pallas_call(
        functools.partial(_propagate_proj_kernel, eps=eps, h_resident=h_resident),
        out_shape=jax.ShapeDtypeStruct((n, p_dim), jnp.float32),
        grid=(n // tile_rows, num_k),
        in_specs=[
            pl.BlockSpec((tile_rows, tile_k), lambda i, k: (i, k)),
            h_spec,
            pl.BlockSpec((e, p_dim), lambda i, k: (0, 0)),
            pl.BlockSpec((1, p_dim), lambda i, k: (0, 0)),
            pl.BlockSpec((p_dim, p_dim), lambda i, k: (0, 0)),
            pl.BlockSpec((1, p_dim), lambda i, k: (0, 0)),
        ],
        out_specs=pl.BlockSpec((tile_rows, p_dim), lambda i, k: (i, 0)),
        scratch_shapes=[pltpu.VMEM((tile_rows, e), jnp.float32)],
        compiler_params=_cparams(("parallel", "arbitrary"), vmem_limit),
    )(g, h3, w1, b1, w2, b2)


# Projection-only kernel (used only when nlayers == 0).
def _project_kernel(h_ref, w1_ref, b1_ref, w2_ref, b2_ref, o_ref, *, eps):
    o_ref[...] = _proj_norm(h_ref[...].astype(jnp.float32), w1_ref[...],
                            b1_ref[...], w2_ref[...], b2_ref[...],
                            eps).astype(o_ref.dtype)


def project(h, w1, b1, w2, b2, *, tile_rows, vmem_limit, eps=1e-12):
    n, e = h.shape
    p_dim = w2.shape[1]
    return pl.pallas_call(
        functools.partial(_project_kernel, eps=eps),
        out_shape=jax.ShapeDtypeStruct((n, p_dim), jnp.float32),
        grid=(n // tile_rows,),
        in_specs=[
            pl.BlockSpec((tile_rows, e), lambda i: (i, 0)),
            pl.BlockSpec((e, p_dim), lambda i: (0, 0)),
            pl.BlockSpec((1, p_dim), lambda i: (0, 0)),
            pl.BlockSpec((p_dim, p_dim), lambda i: (0, 0)),
            pl.BlockSpec((1, p_dim), lambda i: (0, 0)),
        ],
        out_specs=pl.BlockSpec((tile_rows, p_dim), lambda i: (i, 0)),
        compiler_params=_cparams(("parallel",), vmem_limit),
    )(h, w1, b1, w2, b2)


# ----------------------------------------------------------------------------
# Kernel 3: fused bidirectional InfoNCE statistics.
#   sim = (p1n @ p2n.T) / tau computed ONCE, tiled (i rows, j cols).
#   p2 is pre-transposed + column-chunked in XLA -> NN matmuls in-kernel; the
#   chunked p2^T is VMEM-resident when it fits.  Outputs:
#     diag[i]      = sim[i, i]                     (pos = I)
#     row_sum[i]   = sum_{j != i} exp(sim[i, j])   (neg = 1 - I)
#     col partial  = per-row-tile sums of exp(sim[:, j]) excluding diag,
#                    reduced over row tiles in JAX.
#   Masks (identity / padding validity) are built with iota ONLY on the tiles
#   that need them (i == j, last row/col tile); interior tiles are mask-free.
#   No max-shift: inputs are L2-normalized so |sim| <= 1/tau (asserted in the
#   wrapper against f32 exp-sum overflow).
# ----------------------------------------------------------------------------
def _infonce_pair_kernel(p1_ref, p2t_ref, diag_ref, rowsum_ref, colsum_ref,
                         diag_acc, row_acc, *, inv_tau, n_valid, p2_resident):
    i = pl.program_id(0)
    j = pl.program_id(1)
    num_i = pl.num_programs(0)
    num_j = pl.num_programs(1)
    tm = p1_ref.shape[0]
    tn = colsum_ref.shape[2]

    @pl.when(j == 0)
    def _init():
        diag_acc[...] = jnp.zeros_like(diag_acc)
        row_acc[...] = jnp.zeros_like(row_acc)

    p2t = p2t_ref[j] if p2_resident else p2t_ref[0]        # (proj, tn): NN matmul
    sim = jnp.dot(p1_ref[...], p2t, preferred_element_type=jnp.float32) * inv_tau
    e = jnp.exp(sim)

    needs_mask = (i == j) | (j == num_j - 1) | (i == num_i - 1)

    @pl.when(jnp.logical_not(needs_mask))
    def _fast():      # interior tile: no diagonal, no padded rows/cols
        row_acc[...] += jnp.sum(e, axis=1, keepdims=True)
        colsum_ref[0, :, :] = jnp.sum(e, axis=0, keepdims=True)

    @pl.when(needs_mask)
    def _masked():    # diagonal tile and/or last row/col tile (padding)
        row_ids = lax.broadcasted_iota(jnp.int32, (tm, tn), 0) + i * tm
        col_ids = lax.broadcasted_iota(jnp.int32, (tm, tn), 1) + j * tn
        on_diag = row_ids == col_ids
        off_diag = jnp.logical_not(on_diag)
        col_valid = col_ids < n_valid
        row_valid = row_ids < n_valid
        row_acc[...] += jnp.sum(jnp.where(off_diag & col_valid, e, 0.0),
                                axis=1, keepdims=True)
        diag_acc[...] += jnp.sum(jnp.where(on_diag, sim, 0.0),
                                 axis=1, keepdims=True)
        colsum_ref[0, :, :] = jnp.sum(jnp.where(off_diag & row_valid, e, 0.0),
                                      axis=0, keepdims=True)

    @pl.when(j == num_j - 1)
    def _fin():
        diag_ref[...] = diag_acc[...]
        rowsum_ref[...] = row_acc[...]


def infonce_pair_stats(p1n, p2t3, *, tau, n_valid, tile_n, p2_resident,
                       vmem_limit):
    n, p_dim = p1n.shape
    num_j = p2t3.shape[0]
    num_i = n // tile_n
    assert num_j * tile_n == n            # square tiles: diag only crosses i==j
    if p2_resident:
        p2_spec = pl.BlockSpec((num_j, p_dim, tile_n), lambda i, j: (0, 0, 0))
    else:
        p2_spec = pl.BlockSpec((1, p_dim, tile_n), lambda i, j: (j, 0, 0))
    kern = functools.partial(_infonce_pair_kernel, inv_tau=1.0 / tau,
                             n_valid=n_valid, p2_resident=p2_resident)
    return pl.pallas_call(
        kern,
        out_shape=(
            jax.ShapeDtypeStruct((n, 1), jnp.float32),         # diag
            jax.ShapeDtypeStruct((n, 1), jnp.float32),         # row exp-sums
            jax.ShapeDtypeStruct((num_i, 1, n), jnp.float32),  # col partials
        ),
        grid=(num_i, num_j),
        in_specs=[pl.BlockSpec((tile_n, p_dim), lambda i, j: (i, 0)), p2_spec],
        out_specs=(
            pl.BlockSpec((tile_n, 1), lambda i, j: (i, 0)),
            pl.BlockSpec((tile_n, 1), lambda i, j: (i, 0)),
            pl.BlockSpec((1, 1, tile_n), lambda i, j: (i, 0, j)),
        ),
        scratch_shapes=[pltpu.VMEM((tile_n, 1), jnp.float32),
                        pltpu.VMEM((tile_n, 1), jnp.float32)],
        compiler_params=_cparams(("parallel", "arbitrary"), vmem_limit),
    )(p1n, p2t3)


# ----------------------------------------------------------------------------
# GCL forward wrapper (padding / dtype plumbing + O(N) loss glue in plain JAX)
# ----------------------------------------------------------------------------
def gcl_forward(params, x1, a1, x2, a2, *, nlayers, tau=0.2,
                compute_dtype=jnp.bfloat16, tile_rows=512, tile_k=1024):
    n, din = x1.shape
    emb = params["enc1_w"].shape[1]
    proj = params["p1_w2"].shape[1]

    # No-max-shift exp relies on L2-normalized inputs: |sim| <= 1/tau.
    assert (1.0 / tau) + math.log(max(n, 2)) < 88.0, \
        "tau too small for the no-max-shift InfoNCE exp; add a max-shift"

    vmem_limit = _vmem_limit_bytes()
    tr, tk, n_pad = _choose_tiles(n, tile_rows, tile_k)
    din_p = _round_up(din, _LANE)
    emb_p = _round_up(emb, _LANE)
    proj_p = _round_up(proj, _LANE)

    cd = compute_dtype
    f32 = jnp.float32
    cd_bytes = jnp.dtype(cd).itemsize

    # VMEM-residency decisions (x2 accounts for pipeline double-buffering).
    resid_budget = vmem_limit // 3
    h_resident = (n_pad * emb_p * cd_bytes * 2) <= resid_budget
    p2_resident = (n_pad * proj_p * 4 * 2) <= resid_budget

    num_k = n_pad // tk     # h chunks along the propagation contraction
    num_j = n_pad // tr     # InfoNCE column tiles (square tiles of size tr)

    def prep_enc(wkey, bkey):
        w = _pad2(params[wkey], din_p, emb_p).astype(cd)
        b = _pad2(params[bkey], 1, emb_p).astype(f32)
        return w, b

    def prep_proj(prefix):
        w1 = _pad2(params[prefix + "_w1"], emb_p, proj_p).astype(cd)
        b1 = _pad2(params[prefix + "_b1"], 1, proj_p).astype(f32)
        w2 = _pad2(params[prefix + "_w2"], proj_p, proj_p).astype(cd)
        b2 = _pad2(params[prefix + "_b2"], 1, proj_p).astype(f32)
        return w1, b1, w2, b2

    def chunks(h):          # (n_pad, e) -> (num_k, tk, e) contiguous row chunks
        return h.reshape(num_k, tk, h.shape[1])

    def branch(x, a, wkey, bkey, proj_prefix):
        xp = _pad2(x, n_pad, din_p).astype(cd)
        ap = _pad2(a, n_pad, n_pad).astype(cd)      # bf16 g stream by default
        w, b = prep_enc(wkey, bkey)
        w1, b1, w2, b2 = prep_proj(proj_prefix)

        h = encode(xp, w, b, tile_rows=tr, vmem_limit=vmem_limit)
        for _ in range(max(nlayers - 1, 0)):
            h = propagate(ap, chunks(h), tile_rows=tr, tile_k=tk,
                          h_resident=h_resident,
                          vmem_limit=vmem_limit).astype(cd)
        if nlayers >= 1:
            return propagate_project(ap, chunks(h), w1, b1, w2, b2,
                                     tile_rows=tr, tile_k=tk,
                                     h_resident=h_resident,
                                     vmem_limit=vmem_limit)
        return project(h, w1, b1, w2, b2, tile_rows=tr, vmem_limit=vmem_limit)

    # L2-normalized projections, stored in f32 (tight InfoNCE numerics).
    p1 = branch(x1, a1, "enc1_w", "enc1_b", "p1")
    p2 = branch(x2, a2, "enc2_w", "enc2_b", "p2")

    # Transpose + column-chunk p2 once in XLA -> NN matmuls inside the kernel.
    p2t3 = p2.T.reshape(proj_p, num_j, tr).transpose(1, 0, 2)  # (num_j, proj, tr)

    diag, rowsum, colpart = infonce_pair_stats(
        p1, p2t3, tau=tau, n_valid=n, tile_n=tr,
        p2_resident=p2_resident, vmem_limit=vmem_limit)

    d = diag[:n, 0]
    row_sum = rowsum[:n, 0]
    col_sum = jnp.sum(colpart, axis=0)[0, :n]
    loss0 = -jnp.mean(d - jnp.log(row_sum))    # infonce(p1, p2)
    loss1 = -jnp.mean(d - jnp.log(col_sum))    # infonce(p2, p1)  (= sim.T)
    return 0.5 * (loss0 + loss1)


# Pure-JAX reference (exact original math, f32, pos = I / neg = 1 - I).
def gcl_forward_ref(params, x1, a1, x2, a2, *, nlayers, tau=0.2):
    def enc(x, w, b, g):
        h = jnp.maximum(x @ w + b, 0.0)
        for _ in range(nlayers):
            h = g @ h
        return h

    def proj(h, w1, b1, w2, b2):
        return jnp.maximum(h @ w1 + b1, 0.0) @ w2 + b2

    n = x1.shape[0]
    pos = jnp.eye(n, dtype=jnp.float32)
    neg = 1.0 - pos

    def nce(a, s):
        eps = 1e-12
        an = a / jnp.maximum(jnp.linalg.norm(a, axis=1, keepdims=True), eps)
        sn = s / jnp.maximum(jnp.linalg.norm(s, axis=1, keepdims=True), eps)
        sim = an @ sn.T / tau
        exp_sim = jnp.exp(sim) * neg
        log_prob = sim - jnp.log(jnp.sum(exp_sim, axis=1, keepdims=True))
        loss = jnp.sum(log_prob * pos, axis=1) / jnp.sum(pos, axis=1)
        return -jnp.mean(loss)

    e1 = enc(x1, params["enc1_w"], params["enc1_b"], a1)
    e2 = enc(x2, params["enc2_w"], params["enc2_b"], a2)
    q1 = proj(e1, params["p1_w1"], params["p1_b1"], params["p1_w2"], params["p1_b2"])
    q2 = proj(e2, params["p2_w1"], params["p2_b1"], params["p2_w2"], params["p2_b2"])
    return (nce(q1, q2) + nce(q2, q1)) / 2.0


if __name__ == "__main__":
    # Small, module-consistent shapes (non-aligned on purpose to exercise padding).
    N = 200
    in_dim = 48
    emb_dim = 64
    proj_dim = 96
    nlayers = 2       # SGC propagation steps; nlayers_proj = 2; batch_size = 0; sparse = False
    tau = 0.2

    key = jax.random.PRNGKey(0)
    ks = jax.random.split(key, 16)

    def u(k, shape, scale):
        return jax.random.uniform(k, shape, jnp.float32, -scale, scale)

    params = {
        "enc1_w": u(ks[0], (in_dim, emb_dim), (1.0 / in_dim) ** 0.5),
        "enc1_b": u(ks[1], (1, emb_dim), (1.0 / in_dim) ** 0.5),
        "enc2_w": u(ks[2], (in_dim, emb_dim), (1.0 / in_dim) ** 0.5),
        "enc2_b": u(ks[3], (1, emb_dim), (1.0 / in_dim) ** 0.5),
        "p1_w1": u(ks[4], (emb_dim, proj_dim), (1.0 / emb_dim) ** 0.5),
        "p1_b1": u(ks[5], (1, proj_dim), (1.0 / emb_dim) ** 0.5),
        "p1_w2": u(ks[6], (proj_dim, proj_dim), (1.0 / proj_dim) ** 0.5),
        "p1_b2": u(ks[7], (1, proj_dim), (1.0 / proj_dim) ** 0.5),
        "p2_w1": u(ks[8], (emb_dim, proj_dim), (1.0 / emb_dim) ** 0.5),
        "p2_b1": u(ks[9], (1, proj_dim), (1.0 / emb_dim) ** 0.5),
        "p2_w2": u(ks[10], (proj_dim, proj_dim), (1.0 / proj_dim) ** 0.5),
        "p2_b2": u(ks[11], (1, proj_dim), (1.0 / proj_dim) ** 0.5),
    }

    x1 = jax.random.normal(ks[12], (N, in_dim), jnp.float32)
    x2 = jax.random.normal(ks[13], (N, in_dim), jnp.float32)

    # Dense, row-normalized random adjacency matrices (sparse=False path).
    def make_adj(k):
        a = jax.random.uniform(k, (N, N), jnp.float32)
        a = (a > 0.5).astype(jnp.float32) + jnp.eye(N, dtype=jnp.float32)
        return a / jnp.sum(a, axis=1, keepdims=True)

    a1 = make_adj(ks[14])
    a2 = make_adj(ks[15])

    ref = gcl_forward_ref(params, x1, a1, x2, a2, nlayers=nlayers, tau=tau)

    # f32 matmul path (strict correctness check against the pure-JAX reference).
    loss_f32 = gcl_forward(params, x1, a1, x2, a2, nlayers=nlayers, tau=tau,
                           compute_dtype=jnp.float32)
    loss_f32 = jax.block_until_ready(loss_f32)
    assert jnp.allclose(loss_f32, ref, rtol=1e-3, atol=1e-3), (loss_f32, ref)

    # Default bf16 matmul path (halves the dominant g HBM stream; f32
    # accumulation, f32 norms/exp/log, f32 projections feeding InfoNCE).
    loss_bf16 = gcl_forward(params, x1, a1, x2, a2, nlayers=nlayers, tau=tau)
    loss_bf16 = jax.block_until_ready(loss_bf16)
    assert jnp.allclose(loss_bf16, ref, rtol=5e-2, atol=5e-2), (loss_bf16, ref)

    print("KERNEL_OK")
</pallas_src>

<mosaic_0001>
module attributes {stable_mosaic.version = 11 : i64} {
  func.func @_encode_kernel(%arg0: i32, %arg1: memref<128x128xf32, #tpu.memory_space<vmem>>, %arg2: memref<128x128xf32, #tpu.memory_space<vmem>>, %arg3: memref<1x128xf32, #tpu.memory_space<vmem>>, %arg4: memref<128x128xf32, #tpu.memory_space<vmem>>) attributes {dimension_semantics = [#tpu.dimension_semantics<parallel>], iteration_bounds = array<i64: 2>, scalar_prefetch = 0 : i64, scratch_operands = 0 : i64, tpu.core_type = #tpu.core_type<tc>, window_params = [{transform_indices = @transform_0, window_bounds = array<i64: 128, 128>}, {pipeline_mode = #tpu.pipeline_mode<synchronous>, transform_indices = @transform_1, window_bounds = array<i64: 128, 128>}, {pipeline_mode = #tpu.pipeline_mode<synchronous>, transform_indices = @transform_2, window_bounds = array<i64: 1, 128>}, {transform_indices = @transform_3, window_bounds = array<i64: 128, 128>}]} {
    %c0 = arith.constant 0 : index
    %c0_0 = arith.constant 0 : index
    %0 = vector.load %arg1[%c0, %c0_0] : memref<128x128xf32, #tpu.memory_space<vmem>>, vector<128x128xf32>
    %c0_1 = arith.constant 0 : index
    %c0_2 = arith.constant 0 : index
    %1 = vector.load %arg2[%c0_1, %c0_2] : memref<128x128xf32, #tpu.memory_space<vmem>>, vector<128x128xf32>
    %cst = arith.constant dense<0.000000e+00> : vector<128x128xf32>
    %2 = tpu.matmul %0, %1, %cst {dimension_numbers = #tpu.dot_dimension_numbers<[1], [0], [0], [1], [0, 0, 1, 1], [], []>} : vector<128x128xf32>, vector<128x128xf32>, vector<128x128xf32> -> vector<128x128xf32>
    %c0_3 = arith.constant 0 : index
    %c0_4 = arith.constant 0 : index
    %3 = vector.load %arg3[%c0_3, %c0_4] : memref<1x128xf32, #tpu.memory_space<vmem>>, vector<1x128xf32>
    %4 = vector.broadcast %3 : vector<1x128xf32> to vector<128x128xf32>
    %5 = arith.addf %2, %4 : vector<128x128xf32>
    %cst_5 = arith.constant 0.000000e+00 : f32
    %6 = vector.broadcast %cst_5 : f32 to vector<128x128xf32>
    %7 = arith.maximumf %5, %6 : vector<128x128xf32>
    %c0_6 = arith.constant 0 : index
    %c0_7 = arith.constant 0 : index
    %8 = vector.load %arg4[%c0_6, %c0_7] : memref<128x128xf32, #tpu.memory_space<vmem>>, vector<128x128xf32>
    tpu.vector_store %arg4[%c0_6, %c0_7], %7 {strides = array<i32>} : memref<128x128xf32, #tpu.memory_space<vmem>>, vector<128x128xf32>,
    return
  }
  func.func @transform_0(%arg0: i32) -> (i32, i32) {
    %c0_i32 = arith.constant 0 : i32
    %c0_i32_0 = arith.constant 0 : i32
    return %arg0, %c0_i32 : i32, i32
  }
  func.func @transform_1(%arg0: i32) -> (i32, i32) {
    %c0_i32 = arith.constant 0 : i32
    %c0_i32_0 = arith.constant 0 : i32
    %c0_i32_1 = arith.constant 0 : i32
    return %c0_i32, %c0_i32_0 : i32, i32
  }
  func.func @transform_2(%arg0: i32) -> (i32, i32) {
    %c0_i32 = arith.constant 0 : i32
    %c0_i32_0 = arith.constant 0 : i32
    %c0_i32_1 = arith.constant 0 : i32
    return %c0_i32, %c0_i32_0 : i32, i32
  }
  func.func @transform_3(%arg0: i32) -> (i32, i32) {
    %c0_i32 = arith.constant 0 : i32
    %c0_i32_0 = arith.constant 0 : i32
    return %arg0, %c0_i32 : i32, i32
  }
}

</mosaic_0001>

<bundles_post_ra>
// kernel: tpu_custom_call.1
= control target key start
LH: loop header
LB: loop body
LE: loop exit
PB: predicated region body
PF: predicated region fallthrough
CT: control target
= control target key end

     0   :  { %8 = vsyncpa [#allocation3], 0  ;;  %s1143_s0 = inlined_call_operand.hbm [shape: f32[256,128], index: 0, kind: input, shape index: {}]   ;;  %s1144_s1 = inlined_call_operand.hbm [shape: f32[128,128], index: 1, kind: input, shape index: {}]   ;;  %s1145_s2 = inlined_call_operand.vmem [shape: f32[1,128], index: 2, kind: input, shape index: {}]   ;;  %s1146_s3 = inlined_call_operand.hbm [shape: f32[256,128], index: 3, kind: output, shape index: {}]  }
   0x1   :  { %10 = vsyncpa [#allocation3 + $0x1], 0 }
   0x2   :  { %11 = vsyncpa [#allocation6], 0 }
   0x3   :  { %12 = vsyncpa [#allocation4], 0 }
   0x4   :  { %14 = vsyncpa [#allocation4 + $0x1], 0  ;;  %s892_s12 = smov 0   ;;  %s894_s13 = smov 0  }
   0x5   :  { %s896_s14 = smov 0   ;;  %s898_s15 = smov 0  }
   0x6 LB: > { %s913_s16 = sadd.s32 4294967295, %s863_s15   ;;  %s519_s17 = sadd.s32 4294967294, %s863_s15   ;;  %s863_s15 = sphi %s898_s15, %s1166_s15   ;;  %s859_s14 = sphi %s896_s14, %s1165_s14   ;;  %s855_s13 = sphi %s894_s13, %s1164_s13   ;;  %s851_s12 = sphi %s892_s12, %s1163_s12  }
   0x7   : > { %p40_p0 = scmp.ne.s32.totalorder %s855_s13, %s851_s12  ;;  %p1147_p1 = scmp.eq.s32.totalorder %s913_s16, 0 }
   0x8   : > { %p112_p3 = scmp.eq.s32.totalorder %s519_s17, 1  ;;  %p520_p5 = scmp.ge.s32.totalorder %s863_s15, 1 }
   0x9   : > { %p922_p4 = por %p1147_p1, %p40_p0  ;;  %p119_p7 = scmp.lt.s32.totalorder %s863_s15, 3 }
   0xa   : > { %p927_p6 = por %p112_p3, %p40_p0  ;;  %s865_s21 = smov [#allocation5]  }
   0xb   : > { %s1150_s18 = scalar_select %p922_p4, 1, 0 }
   0xc   : > { %s1151_s19 = scalar_select %p927_p6, 1, 0 }
   0xd   : > { %p932_p8 = pnand %p520_p5, %p119_p7  ;;  %s131_s22 = sshll.u32 %s865_s21, 4  ;;  %s936_s22 = int_to_ptr.vmem [resolvable:$true] %s131_s22 }
   0xe   : > { %s948_s24 = sadd.s32 1, %s863_s15   ;;  %s27_s25 = sadd.s32 1, %s859_s14 }
   0xf   : > { %s1152_s20 = scalar_select %p932_p8, 1, 0 }
  0x10   : > { %p682_p9 = pneg %p932_p8  ;;  %s24_s26 = ssub.s32 %s863_s15, %s948_s24 }
  0x11   : > { %s735_s29 = scalar_lea.hbm %s1144_s1, 2048 }
  0x12   : > { %p943_p11 = pnand %p682_p9, %p1147_p1  ;;  %p736_p12 = scmp.ne.s32.totalorder %s1144_s1, %s735_s29 }
  0x13   : > { %p742_p5 = scmp.lt.u32.totalorder %s735_s29, %s1144_s1 }
  0x14   : > { %p737_p13 = pneg %p943_p11 }
  0x16   : > { %p738_p0 = pnand %p737_p13, %p736_p12 }
  0x18   : > { %p739_p3 = pneg %p738_p0 }
  0x1a   : > { %p744_p7 = pnand %p742_p5, %p739_p3 }
  0x1c   : > { %747 = shalt.err (!%p744_p7)
}
  0x1d   : > { %s748_s7 = scalar_lea.vmem %s936_s22, 2048  ;;  %p756_p2 = scmp.lt.s32.totalorder %s936_s22, %s936_s22 }
  0x1e   : > { %p749_p9 = scmp.ne.s32.totalorder %s936_s22, %s748_s7  ;;  %p757_p6 = scmp.lt.s32.totalorder %s748_s7, %s748_s7 }
  0x20   : > { %p751_p10 = pnand %p749_p9, %p737_p13  ;;  %p758_p4 = por %p757_p6, %p756_p2 }
  0x22   : > { %p752_p1 = pneg %p751_p10 }
  0x24   : > { %p759_p8 = pnand %p758_p4, %p752_p1 }
  0x26   : > { %762 = shalt.err (!%p759_p8)
}
  0x27   : > { %s866_s8 = smov 128   ;;  %s867_s9 = smov 8  }
  0x28   : > { %685 = dma.hbm_to_vmem [thread:$0]  (!%p943_p11), %s1144_s1, 2048, %s936_s22, [#allocation6], %s866_s8, %s866_s8, %s867_s9  }
  0x29   : > { %p25_p1 = scmp.eq.s32.totalorder %s24_s26, 0  ;;  %p34_p2 = scmp.ne.s32.totalorder %s859_s14, %s855_s13 }
  0x2a   : > { %p35_p4 = scmp.eq.s32.totalorder %s863_s15, 0  ;;  %p695_p6 = scmp.lt.s32.totalorder %s863_s15, 2 }
  0x2b   : > { %s982_s17 = scalar_select %p25_p1, %s859_s14, %s27_s25  }
  0x2c   : > { %p36_p8 = por %p35_p4, %p34_p2  ;;  %p1154_p10 = scmp.eq.s32.totalorder %s913_s16, 1 }
  0x2d   : > { %s148_s23 = sand.u32 1, %s859_s14   ;;  %s536_s27 = sshll.u32 %s863_s15, 11 }
  0x2e   : > { %p986_p12 = por %p1154_p10, %p34_p2  ;;  %s523_s28 = sshll.u32 %s148_s23, 7 }
  0x2f   : > { %s995_s4 = scalar_lea.hbm %s1143_s0, %s536_s27  ;;  %s152_s22 = scalar_lea.vmem [#allocation2], %s523_s28 }
  0x30   : > { %s159_s25 = sshll.u32 %s152_s22, 4  ;;  %p997_p11 = pnand %p695_p6, %p36_p8  ;;  %s1001_s25 = int_to_ptr.vmem [resolvable:$true] %s159_s25 }
  0x31   : > { %s1003_s5 = scalar_lea.sflag [#allocation3], %s148_s23  ;;  %s763_s6 = scalar_lea.hbm %s995_s4, 2048 }
  0x32   : > { %p764_p13 = scmp.ne.s32.totalorder %s995_s4, %s763_s6  ;;  %p765_p0 = pneg %p997_p11 }
  0x33   : > { %s768_s11 = scalar_lea.hbm %s1143_s0, 4096  ;;  %p769_p7 = scmp.lt.u32.totalorder %s995_s4, %s1143_s0 }
  0x34   : > { %p766_p3 = pnand %p765_p0, %p764_p13  ;;  %p770_p9 = scmp.lt.u32.totalorder %s768_s11, %s763_s6 }
  0x35   : > { %p772_p2 = scmp.lt.u32.totalorder %s763_s6, %s995_s4 }
  0x36   : > { %p767_p5 = pneg %p766_p3  ;;  %p771_p1 = por %p770_p9, %p769_p7 }
  0x38   : > { %p773_p4 = por %p772_p2, %p771_p1 }
  0x3a   : > { %p774_p6 = pnand %p773_p4, %p767_p5 }
  0x3c   : > { %777 = shalt.err (!%p774_p6)
}
  0x3d   : > { %s778_s23 = scalar_lea.vmem %s1001_s25, 2048  ;;  %s868_s29 = smov [#allocation2]  }
  0x3e   : > { %p779_p8 = scmp.ne.s32.totalorder %s1001_s25, %s778_s23  ;;  %s783_s30 = sshll.u32 %s868_s29, 4  ;;  %s784_s30 = int_to_ptr.vmem [resolvable:$false] %s783_s30 }
  0x3f   : > { %s785_s22 = scalar_lea.vmem %s784_s30, 4096  ;;  %p786_p3 = scmp.lt.s32.totalorder %s1001_s25, %s784_s30 }
  0x40   : > { %p781_p10 = pnand %p779_p8, %p765_p0  ;;  %p787_p7 = scmp.lt.s32.totalorder %s785_s22, %s778_s23 }
  0x42   : > { %p782_p13 = pneg %p781_p10  ;;  %p788_p9 = por %p787_p7, %p786_p3 }
  0x44   : > { %p789_p1 = pnand %p788_p9, %p782_p13 }
  0x46   : > { %792 = shalt.err (!%p789_p1)
}
  0x47   : > { %689 = dma.hbm_to_vmem [thread:$0]  (!%p997_p11), %s995_s4, 2048, %s1001_s25, %s1003_s5, %s866_s8, %s866_s8, %s867_s9  }
  0x48   : > { %p1157_p0 = scmp.ne.s32.totalorder %s1152_s20, 0 }
  0x49   : > { %s1037_s6 = sand.u32 (!%p1157_p0), 1, %s855_s13   ;;  %p1158_p5 = scmp.ne.s32.totalorder (!%p1157_p0), %s1150_s18, 0 }
  0x4a   : > { %171 = sbr.rel (%p1157_p0) target bundleno = 364 (0x16c), region = 32  ;;  %s527_s7 = sshll.u32 (!%p1157_p0), %s1037_s6, 7 }
  0x4b   : > { %s174_s10 = scalar_lea.sflag (!%p1157_p0), [#allocation3], %s1037_s6  ;;  %s1043_s26 = scalar_lea.vmem (!%p1157_p0), [#allocation2], %s527_s7 }
  0x51   : > { %838 = dma.done.wait (%p1158_p5), %s174_s10, 2048  }
  0x52   : > { %840 = vsyncadd (%p1158_p5), %s174_s10, 4294965248  ;;  %p1159_p11 = scmp.eq.s32.totalorder %s913_s16, 0 }
  0x54   : > { %842 = dma.done.wait (%p1159_p11), [#allocation6], 2048   ;;  %p1160_p2 = pmov %p1159_p11 }
  0x55   : > { %v222_v0 = vld [vmem:[#allocation5] sm:$0xff]  ;;  %v223_v1 = vld [vmem:[#allocation5 + $0x8] sm:$0xff]  ;;  %v224_v2 = vld [vmem:[#allocation5 + $0x10] sm:$0xff]  ;;  %s1074_s8 = scalar_lea.vmem [#allocation7], %s527_s7  ;;  %s537_s9 = sshll.u32 %s913_s16, 11 }
  0x56   : > { %844 = vsyncadd (%p1160_p2), [#allocation6], 4294965248  ;;  %v626_v3 = vpack.c.bf16 %v223_v1, %v222_v0  ;;  %v225_v4 = vld [vmem:[#allocation5 + $0x18] sm:$0xff]  ;;  %v226_v6 = vld [vmem:[#allocation5 + $0x20] sm:$0xff]  ;;  %s436_s4 = sshll.u32 %s1074_s8, 4  ;;  %s1093_s5 = scalar_lea.hbm %s1146_s3, %s537_s9  ;;  %s1095_s4 = int_to_ptr.vmem [resolvable:$true] %s436_s4 }
  0x57   : > { %v630_v5 = vpack.c.bf16 %v225_v4, %v224_v2  ;;  %v227_v7 = vld [vmem:[#allocation5 + $0x28] sm:$0xff]  ;;  %v206_v9 = vld [vmem:[%s1043_s26] sm:$0xff]  ;;  %v228_v11 = vld [vmem:[#allocation5 + $0x30] sm:$0xff]  ;;  %s423_s11 = scalar_lea.sflag [#allocation4], %s1037_s6  ;;  %s793_s27 = scalar_lea.vmem %s1095_s4, 2048 }
  0x58   : > { %627 = vmatprep.subr.bf16.mxu0 %v626_v3  ;;  %658 = vmatprep.subr.bf16.mxu1 %v626_v3  ;;  %v634_v8 = vpack.c.bf16 %v227_v7, %v226_v6  ;;  %v214_v10 = vld [vmem:[%s1043_s26 + $0x40] sm:$0xff]  ;;  %v229_v12 = vld [vmem:[#allocation5 + $0x38] sm:$0xff]  ;;  %v231_v15 = vld [vmem:[#allocation5 + $0x48] sm:$0xff]  ;;  %p794_p4 = scmp.ne.s32.totalorder %s1095_s4, %s793_s27  ;;  %s869_s28 = smov [#allocation7]  }
  0x59   : > { %629 = vmatpush3.bf16.msra.mxu0 %v626_v3  ;;  %666 = vmatpush3.bf16.msra.mxu1 %v626_v3  ;;  %v638_v13 = vpack.c.bf16 %v229_v12, %v228_v11  ;;  %v230_v14 = vld [vmem:[#allocation5 + $0x40] sm:$0xff]  ;;  %v232_v17 = vld [vmem:[#allocation5 + $0x50] sm:$0xff]  ;;  %v233_v18 = vld [vmem:[#allocation5 + $0x58] sm:$0xff]  ;;  %s797_s23 = sshll.u32 %s869_s28, 4  ;;  %s798_s23 = int_to_ptr.vmem [resolvable:$false] %s797_s23 }
  0x5a   : > { %631 = vmatprep.subr.bf16.mxu0 %v630_v5  ;;  %659 = vmatprep.subr.bf16.mxu1 %v630_v5  ;;  %v642_v16 = vpack.c.bf16 %v231_v15, %v230_v14  ;;  %v646_v19 = vpack.c.bf16 %v233_v18, %v232_v17  ;;  %v234_v20 = vld [vmem:[#allocation5 + $0x60] sm:$0xff]  ;;  %v235_v21 = vld [vmem:[#allocation5 + $0x68] sm:$0xff]  ;;  %v236_v23 = vld [vmem:[#allocation5 + $0x70] sm:$0xff]  ;;  %p795_p6 = pnand %p794_p4, %p986_p12  ;;  %s799_s29 = scalar_lea.vmem %s798_s23, 4096 }
  0x5b   : > { %602 = vmatprep.mubr.f32.mxu0 %v206_v9  ;;  %614 = vmatprep.mubr.f32.mxu1 %v214_v10  ;;  %v650_v22 = vpack.c.bf16 %v235_v21, %v234_v20  ;;  %v237_v24 = vld [vmem:[#allocation5 + $0x78] sm:$0xff]  ;;  %v207_v26 = vld [vmem:[%s1043_s26 + $0x8] sm:$0xff]  ;;  %v208_v28 = vld [vmem:[%s1043_s26 + $0x10] sm:$0xff]  ;;  %p800_p10 = scmp.lt.s32.totalorder %s1095_s4, %s798_s23  ;;  %p801_p13 = scmp.lt.s32.totalorder %s799_s29, %s793_s27 }
  0x5c   : > { %v654_v25 = vpack.c.bf16 %v237_v24, %v236_v23  ;;  %v215_v27 = vld [vmem:[%s1043_s26 + $0x48] sm:$0xff]  ;;  %v216_v29 = vld [vmem:[%s1043_s26 + $0x50] sm:$0xff]  ;;  %v209_v30 = vld [vmem:[%s1043_s26 + $0x18] sm:$0xff]  ;;  %p796_p8 = pneg %p795_p6 }
  0x5d   : > { %633 = vmatpush3.bf16.msra.mxu0 %v630_v5  ;;  %667 = vmatpush3.bf16.msra.mxu1 %v630_v5  ;;  %v217_v31 = vld [vmem:[%s1043_s26 + $0x58] sm:$0xff]  ;;  %v210_v32 = vld [vmem:[%s1043_s26 + $0x20] sm:$0xff]  ;;  %v211_v34 = vld [vmem:[%s1043_s26 + $0x28] sm:$0xff]  ;;  %p802_p3 = por %p801_p13, %p800_p10 }
  0x5e   : > { %635 = vmatprep.subr.bf16.mxu0 %v634_v8  ;;  %660 = vmatprep.subr.bf16.mxu1 %v634_v8  ;;  %v218_v33 = vld [vmem:[%s1043_s26 + $0x60] sm:$0xff]  ;;  %v219_v35 = vld [vmem:[%s1043_s26 + $0x68] sm:$0xff]  ;;  %v212_v36 = vld [vmem:[%s1043_s26 + $0x30] sm:$0xff] }
  0x5f   : > { %v220_v37 = vld [vmem:[%s1043_s26 + $0x70] sm:$0xff]  ;;  %v213_v38 = vld [vmem:[%s1043_s26 + $0x38] sm:$0xff]  ;;  %v530_v40 = vld [vmem:[%s1145_s2] ss:$0 sm:$0xff]  ;;  %p803_p7 = pnand %p802_p3, %p796_p8 }
  0x60   : > { %v221_v39 = vld [vmem:[%s1043_s26 + $0x78] sm:$0xff] }
  0x61   : > { %637 = vmatpush3.bf16.msra.mxu0 %v634_v8  ;;  %668 = vmatpush3.bf16.msra.mxu1 %v634_v8 }
  0x62   : > { %639 = vmatprep.subr.bf16.mxu0 %v638_v13  ;;  %661 = vmatprep.subr.bf16.mxu1 %v638_v13 }
  0x65   : > { %641 = vmatpush3.bf16.msra.mxu0 %v638_v13  ;;  %669 = vmatpush3.bf16.msra.mxu1 %v638_v13 }
  0x66   : > { %643 = vmatprep.subr.bf16.mxu0 %v642_v16  ;;  %662 = vmatprep.subr.bf16.mxu1 %v642_v16 }
  0x69   : > { %645 = vmatpush3.bf16.msra.mxu0 %v642_v16  ;;  %670 = vmatpush3.bf16.msra.mxu1 %v642_v16 }
  0x6a   : > { %647 = vmatprep.subr.bf16.mxu0 %v646_v19  ;;  %663 = vmatprep.subr.bf16.mxu1 %v646_v19 }
  0x6d   : > { %649 = vmatpush3.bf16.msra.mxu0 %v646_v19  ;;  %671 = vmatpush3.bf16.msra.mxu1 %v646_v19 }
  0x6e   : > { %651 = vmatprep.subr.bf16.mxu0 %v650_v22  ;;  %664 = vmatprep.subr.bf16.mxu1 %v650_v22 }
  0x71   : > { %653 = vmatpush3.bf16.msra.mxu0 %v650_v22  ;;  %672 = vmatpush3.bf16.msra.mxu1 %v650_v22 }
  0x72   : > { %655 = vmatprep.subr.bf16.mxu0 %v654_v25  ;;  %665 = vmatprep.subr.bf16.mxu1 %v654_v25 }
  0x75   : > { %657 = vmatpush3.bf16.msra.mxu0 %v654_v25  ;;  %673 = vmatpush3.bf16.msra.mxu1 %v654_v25 }
  0x78   : > { %603 = vmatmul.mubr.f32.vlgmr.msra.gmra.mrb[0].mxu0 %v207_v26  ;;  %615 = vmatmul.mubr.f32.vlgmr.msra.gmra.mrb[0].mxu1 %v215_v27 }
  0x79   : > { %605 = vmatprep.mubr.f32.mxu0 %v208_v28  ;;  %617 = vmatprep.mubr.f32.mxu1 %v216_v29 }
  0x7c   : > { %606 = vmatmul.mubr.f32.gmra.mrb[2].mxu0 %v209_v30  ;;  %618 = vmatmul.mubr.f32.gmra.mrb[2].mxu1 %v217_v31 }
  0x7d   : > { %608 = vmatprep.mubr.f32.mxu0 %v210_v32  ;;  %620 = vmatprep.mubr.f32.mxu1 %v218_v33 }
  0x80   : > { %609 = vmatmul.mubr.f32.gmra.mrb[4].mxu0 %v211_v34  ;;  %621 = vmatmul.mubr.f32.gmra.mrb[4].mxu1 %v219_v35 }
  0x81   : > { %611 = vmatprep.mubr.f32.mxu0 %v212_v36  ;;  %623 = vmatprep.mubr.f32.mxu1 %v220_v37 }
  0x84   : > { %612 = vmatmul.mubr.f32.gmra.mrb[6].mxu0 %v213_v38  ;;  %624 = vmatmul.mubr.f32.gmra.mrb[6].mxu1 %v221_v39 }
 0x14b   : > { %v604_v41 = vpop.f32.mrb[0].mxu0  ;;  %v616_v42 = vpop.f32.mrb[0].mxu1 }
 0x14c   : > { %v317_v43 = vadd.f32 %v604_v41, %v530_v40  ;;  %v357_v44 = vadd.f32 %v616_v42, %v530_v40  ;;  %v311_v45 = vpop.f32.mrb[1].mxu0  ;;  %v351_v46 = vpop.f32.mrb[1].mxu1 }
 0x14d   : > { %v312_v47 = vadd.f32 %v530_v40, %v311_v45  ;;  %v352_v48 = vadd.f32 %v530_v40, %v351_v46 }
 0x14e   : > { %v391_v49 = vmax.f32 %v317_v43, 0.0  ;;  %v399_v50 = vmax.f32 %v357_v44, 0.0 }
 0x14f   : > { %v390_v51 = vmax.f32 %v312_v47, 0.0  ;;  %v398_v52 = vmax.f32 %v352_v48, 0.0  ;;  %v607_v53 = vpop.f32.mrb[2].mxu0  ;;  %v619_v54 = vpop.f32.mrb[2].mxu1 }
 0x150   : > { %407 = vst [vmem:[%s1074_s8 + $0x8] sm:$0xff] %v391_v49  ;;  %415 = vst [vmem:[%s1074_s8 + $0x48] sm:$0xff] %v399_v50  ;;  %v327_v55 = vadd.f32 %v607_v53, %v530_v40  ;;  %v367_v56 = vadd.f32 %v619_v54, %v530_v40  ;;  %v321_v57 = vpop.f32.mrb[3].mxu0  ;;  %v361_v58 = vpop.f32.mrb[3].mxu1 }
 0x151   : > { %406 = vst [vmem:[%s1074_s8] sm:$0xff] %v390_v51  ;;  %414 = vst [vmem:[%s1074_s8 + $0x40] sm:$0xff] %v398_v52  ;;  %v322_v59 = vadd.f32 %v530_v40, %v321_v57  ;;  %v362_v60 = vadd.f32 %v530_v40, %v361_v58 }
 0x152   : > { %v393_v61 = vmax.f32 %v327_v55, 0.0  ;;  %v401_v62 = vmax.f32 %v367_v56, 0.0 }
 0x153   : > { %v392_v63 = vmax.f32 %v322_v59, 0.0  ;;  %v400_v0 = vmax.f32 %v362_v60, 0.0  ;;  %v610_v1 = vpop.f32.mrb[4].mxu0  ;;  %v622_v2 = vpop.f32.mrb[4].mxu1 }
 0x154   : > { %409 = vst [vmem:[%s1074_s8 + $0x18] sm:$0xff] %v393_v61  ;;  %417 = vst [vmem:[%s1074_s8 + $0x58] sm:$0xff] %v401_v62  ;;  %v337_v3 = vadd.f32 %v610_v1, %v530_v40  ;;  %v377_v4 = vadd.f32 %v622_v2, %v530_v40  ;;  %v331_v5 = vpop.f32.mrb[5].mxu0  ;;  %v371_v6 = vpop.f32.mrb[5].mxu1 }
 0x155   : > { %408 = vst [vmem:[%s1074_s8 + $0x10] sm:$0xff] %v392_v63  ;;  %416 = vst [vmem:[%s1074_s8 + $0x50] sm:$0xff] %v400_v0  ;;  %v332_v7 = vadd.f32 %v530_v40, %v331_v5  ;;  %v372_v8 = vadd.f32 %v530_v40, %v371_v6 }
 0x156   : > { %v395_v9 = vmax.f32 %v337_v3, 0.0  ;;  %v403_v10 = vmax.f32 %v377_v4, 0.0 }
 0x157   : > { %v394_v11 = vmax.f32 %v332_v7, 0.0  ;;  %v402_v12 = vmax.f32 %v372_v8, 0.0  ;;  %v613_v13 = vpop.f32.mrb[6].mxu0  ;;  %v625_v14 = vpop.f32.mrb[6].mxu1 }
 0x158   : > { %411 = vst [vmem:[%s1074_s8 + $0x28] sm:$0xff] %v395_v9  ;;  %419 = vst [vmem:[%s1074_s8 + $0x68] sm:$0xff] %v403_v10  ;;  %v347_v15 = vadd.f32 %v613_v13, %v530_v40  ;;  %v387_v16 = vadd.f32 %v625_v14, %v530_v40  ;;  %v341_v17 = vpop.f32.mrb[7].mxu0  ;;  %v381_v18 = vpop.f32.mrb[7].mxu1 }
 0x159   : > { %410 = vst [vmem:[%s1074_s8 + $0x20] sm:$0xff] %v394_v11  ;;  %418 = vst [vmem:[%s1074_s8 + $0x60] sm:$0xff] %v402_v12  ;;  %v342_v19 = vadd.f32 %v530_v40, %v341_v17  ;;  %v382_v20 = vadd.f32 %v530_v40, %v381_v18 }
 0x15a   : > { %v397_v21 = vmax.f32 %v347_v15, 0.0  ;;  %v405_v22 = vmax.f32 %v387_v16, 0.0 }
 0x15b   : > { %v396_v23 = vmax.f32 %v342_v19, 0.0  ;;  %v404_v24 = vmax.f32 %v382_v20, 0.0 }
 0x15c   : > { %413 = vst [vmem:[%s1074_s8 + $0x38] sm:$0xff] %v397_v21  ;;  %421 = vst [vmem:[%s1074_s8 + $0x78] sm:$0xff] %v405_v22 }
 0x15d   : > { %412 = vst [vmem:[%s1074_s8 + $0x30] sm:$0xff] %v396_v23  ;;  %420 = vst [vmem:[%s1074_s8 + $0x70] sm:$0xff] %v404_v24 }
 0x15e   : > { %806 = shalt.err (!%p803_p7)
}
 0x15f   : > { %s807_s30 = scalar_lea.hbm %s1093_s5, 2048  ;;  %s811_s10 = scalar_lea.hbm %s1146_s3, 4096 }
 0x160   : > { %p808_p9 = scmp.ne.s32.totalorder %s1093_s5, %s807_s30  ;;  %p812_p5 = scmp.lt.u32.totalorder %s1093_s5, %s1146_s3 }
 0x161   : > { %p813_p11 = scmp.lt.u32.totalorder %s811_s10, %s807_s30  ;;  %p815_p4 = scmp.lt.u32.totalorder %s807_s30, %s1093_s5 }
 0x162   : > { %p809_p1 = pnand %p808_p9, %p986_p12 }
 0x163   : > { %p814_p2 = por %p813_p11, %p812_p5 }
 0x164   : > { %p810_p0 = pneg %p809_p1 }
 0x165   : > { %p816_p6 = por %p815_p4, %p814_p2 }
 0x167   : > { %p817_p8 = pnand %p816_p6, %p810_p0 }
 0x169   : > { %820 = shalt.err (!%p817_p8)
}
 0x16a   : > { %s870_s20 = smov 128   ;;  %s871_s8 = smov 8  }
 0x16b   : > { %680 = dma.vmem_to_hbm [thread:$0]  (%p986_p12), %s1095_s4, 2048, %s1093_s5, %s423_s11, %s870_s20, %s870_s20, %s871_s8  }
 0x16c PF: > { %s451_s9 = sand.u32 1, %s851_s12   ;;  %p1161_p10 = scmp.ne.s32.totalorder %s1151_s19, 0 }
 0x16d   : > { %p1162_p13 = scmp.ge.s32.totalorder %s863_s15, 2  ;;  %s452_s16 = scalar_lea.sflag [#allocation4], %s451_s9 }
 0x16f   : > { %p691_p3 = pnand %p1162_p13, %p1161_p10 }
 0x171   : > { %846 = dma.done.wait (!%p691_p3), %s452_s16, 2048  }
 0x172   : > { %848 = vsyncadd (!%p691_p3), %s452_s16, 4294965248  ;;  %p17_p7 = scmp.ge.s32.totalorder %s948_s24, 4   ;;  %s1163_s12 = smov %s855_s13 }
 0x173   : > { %s1164_s13 = smov %s859_s14  ;;  %s1165_s14 = smov %s982_s17 }
 0x174   : > { %s1166_s15 = smov %s948_s24  ;;  %19 = sbr.rel (!%p17_p7) target bundleno = 6 (0x6), region = 81 }
 0x17b   :  { %457 = vsyncpa [#allocation3], 1 }
 0x17c   :  { %459 = vsyncpa [#allocation3 + $0x1], 1 }
 0x17d   :  { %460 = vsyncpa [#allocation6], 1 }
 0x17e   :  { %461 = vsyncpa [#allocation4], 1 }
 0x17f   :  { %463 = vsyncpa [#allocation4 + $0x1], 1 }

</bundles_post_ra>
